<compile_context>
chip_gen: v7x
topology: tpu7x:2x2x1
jax: 0.10.0
libtpu: 0.0.40
codegen_flags: <defaults>
</compile_context>

<pallas_src>
import functools

import jax
import jax.numpy as jnp
from jax.experimental import pallas as pl
from jax.experimental.pallas import tpu as pltpu


def _round_up(n, m):
    return ((n + m - 1) // m) * m


def _device_flags():
    """(element-wise dtype, prefer >=2 batch tiles) derived from the local TPU generation."""
    try:
        kind = jax.devices()[0].device_kind.lower()
    except Exception:
        return jnp.float32, False
    # v5e and older have no bf16 VALU -> keep element-wise math in f32 there.
    bf16_valu = not any(tag in kind for tag in ("v2", "v3", "v4", "v5"))
    two_tensorcores = "v7" in kind
    return (jnp.bfloat16 if bf16_valu else jnp.float32), two_tensorcores


_ELEMENTWISE_DTYPE, _PREFER_TWO_TILES = _device_flags()


def _mlp_kernel(x_ref, w1_ref, b1_ref, w2_ref, b2_ref, w3_ref, b3_ref, o_ref):
    # x_ref: (2, TB) with the batch on the lane axis (lane-dense loads/stores).
    xt = x_ref[...]
    w1 = w1_ref[...]                                   # (128, 2)

    # Layer 1 (fan_in = 2): two broadcast multiply-adds on the VPU
    # (an MXU pass with a depth-2 contraction would waste >98% of the systolic array).
    h1 = w1[:, 0:1] * xt[0:1, :] + w1[:, 1:2] * xt[1:2, :] + b1_ref[...]
    h1 = jnp.maximum(h1, 0).astype(jnp.bfloat16)       # (128, TB)

    # Layer 2 (128 x 128): bf16 MXU matmul, f32 accumulation, batch on the MXU-N axis.
    acc = jnp.dot(w2_ref[...], h1, preferred_element_type=jnp.float32)
    b2 = b2_ref[...]                                   # (128, 1) in element-wise dtype
    h2 = jnp.maximum(acc.astype(b2.dtype) + b2, 0)     # (128, TB)

    # Layer 3: (1,128) @ (128,TB) bf16 MXU pass -> lane-dense (1, TB); scalar bias from SMEM.
    out = jnp.dot(w3_ref[...], h2.astype(jnp.bfloat16),
                  preferred_element_type=jnp.float32) + b3_ref[0, 0]
    o_ref[...] = out.astype(o_ref.dtype)


def _choose_tiling(batch, max_tile, prefer_two_tiles):
    """Pad batch only to a multiple of 128; TB is a multiple of 128, <= ~max_tile."""
    bp128 = _round_up(max(batch, 1), 128)
    grid = pl.cdiv(bp128, max_tile)
    if prefer_two_tiles and bp128 >= 256:
        grid = max(grid, 2)                 # keep both v7x TensorCores busy
    grid = min(grid, bp128 // 128)          # TB must stay a multiple of 128
    tb = _round_up(pl.cdiv(bp128, grid), 128)
    return tb, grid, grid * tb


@functools.partial(jax.jit, static_argnums=(2,))
def _forward(x, params, max_tile):
    w1, b1, w2, b2, w3, b3 = params
    ew = _ELEMENTWISE_DTYPE
    B = x.shape[0]
    tb, grid, bp = _choose_tiling(B, max_tile, _PREFER_TWO_TILES)

    # Batch on the lane axis; pad only up to the tiling rule above so blocks divide evenly.
    xt = jnp.pad(x.astype(ew).T, ((0, 0), (0, bp - B)))            # (2, bp)

    w1r = w1.astype(ew)                                # (128, 2)
    b1r = b1.reshape(-1, 1).astype(ew)                 # (128, 1)
    w2r = w2.astype(jnp.bfloat16)                      # (128, 128) MXU operand
    b2r = b2.reshape(-1, 1).astype(ew)                 # (128, 1)
    w3r = w3.astype(jnp.bfloat16)                      # (1, 128)   MXU operand
    b3r = b3.reshape(1, 1).astype(jnp.float32)         # (1, 1) scalar -> SMEM

    # Weights/biases: constant block index -> DMA'd once, resident in VMEM across steps.
    resident = lambda a: pl.BlockSpec(a.shape, lambda i: (0,) * a.ndim)

    ew_bytes = jnp.dtype(ew).itemsize
    vmem_est = (2 * (2 * tb * ew_bytes + tb * 4)       # double-buffered x / out tiles
                + 128 * 128 * 2 + 6 * 128 * 4          # resident weights/biases (generous)
                + 8 * 128 * tb * 4)                    # headroom for h1/h2/f32 accum temps
    vmem_limit = int(min(max(vmem_est, 16 << 20), 48 << 20))

    out_t = pl.pallas_call(
        _mlp_kernel,
        out_shape=jax.ShapeDtypeStruct((1, bp), jnp.float32),
        grid=(grid,),
        in_specs=[
            pl.BlockSpec((2, tb), lambda i: (0, i)),            # x^T batch tile
            resident(w1r), resident(b1r),
            resident(w2r), resident(b2r),
            resident(w3r),
            pl.BlockSpec(memory_space=pltpu.MemorySpace.SMEM),  # scalar bias b3
        ],
        out_specs=pl.BlockSpec((1, tb), lambda i: (0, i)),
        compiler_params=pltpu.CompilerParams(
            dimension_semantics=("parallel",),
            vmem_limit_bytes=vmem_limit,
        ),
    )(xt, w1r, b1r, w2r, b2r, w3r, b3r)

    return out_t[:, :B].T                               # (B, 1)


def mba_forward(x, params, *, max_tile=2048):
    """x: (B, 2) float32 -> (B, 1) float32 (same semantics as MBAModel.forward)."""
    return _forward(x, params, max_tile)


def init_params(key):
    """Deterministic init mimicking PyTorch nn.Linear (uniform +-1/sqrt(fan_in)),
    weights stored in PyTorch (out_features, in_features) orientation."""
    def linear(key, fan_in, fan_out):
        kw, kb = jax.random.split(key)
        bound = 1.0 / jnp.sqrt(jnp.float32(fan_in))
        w = jax.random.uniform(kw, (fan_out, fan_in), jnp.float32, -bound, bound)
        b = jax.random.uniform(kb, (fan_out,), jnp.float32, -bound, bound)
        return w, b

    k1, k2, k3 = jax.random.split(key, 3)
    w1, b1 = linear(k1, 2, 128)
    w2, b2 = linear(k2, 128, 128)
    w3, b3 = linear(k3, 128, 1)
    return (w1, b1, w2, b2, w3, b3)


def _reference(x, params):
    w1, b1, w2, b2, w3, b3 = params
    h1 = jnp.maximum(x @ w1.T + b1, 0.0)
    h2 = jnp.maximum(h1 @ w2.T + b2, 0.0)
    return h2 @ w3.T + b3


if __name__ == "__main__":
    key = jax.random.PRNGKey(0)
    kp, kx = jax.random.split(key)
    params = init_params(kp)

    # bf16 element-wise math (v6e/v7x) needs a slightly larger tolerance than the f32 path.
    tol = 3e-2 if _ELEMENTWISE_DTYPE == jnp.bfloat16 else 2e-2

    # Small shape consistent with the module (2 input features, 1 output).
    batch = 8
    x = jax.random.normal(kx, (batch, 2), jnp.float32)
    out = jax.block_until_ready(mba_forward(x, params))
    ref = _reference(x, params)
    assert out.shape == (batch, 1), out.shape
    assert jnp.allclose(out, ref, atol=tol, rtol=tol), "mismatch vs reference (small batch)"

    # Exercise multi-tile grid + the fixed (<=127-column) ragged-tail padding.
    batch2 = 2500
    x2 = jax.random.normal(jax.random.PRNGKey(1), (batch2, 2), jnp.float32)
    out2 = jax.block_until_ready(mba_forward(x2, params))
    ref2 = _reference(x2, params)
    assert out2.shape == (batch2, 1), out2.shape
    assert jnp.allclose(out2, ref2, atol=tol, rtol=tol), "mismatch vs reference (gridded batch)"

    print("KERNEL_OK")
</pallas_src>

<mosaic_0001>
module attributes {stable_mosaic.version = 11 : i64} {
  func.func @_mlp_kernel(%arg0: i32, %arg1: memref<2x128xbf16, #tpu.memory_space<vmem>>, %arg2: memref<128x2xbf16, #tpu.memory_space<vmem>>, %arg3: memref<128x1xbf16, #tpu.memory_space<vmem>>, %arg4: memref<128x128xbf16, #tpu.memory_space<vmem>>, %arg5: memref<128x1xbf16, #tpu.memory_space<vmem>>, %arg6: memref<1x128xbf16, #tpu.memory_space<vmem>>, %arg7: memref<1x1xf32, #tpu.memory_space<smem>>, %arg8: memref<1x128xf32, #tpu.memory_space<vmem>>) attributes {dimension_semantics = [#tpu.dimension_semantics<parallel>], iteration_bounds = array<i64: 1>, scalar_prefetch = 0 : i64, scratch_operands = 0 : i64, tpu.core_type = #tpu.core_type<tc>, window_params = [{transform_indices = @transform_0, window_bounds = array<i64: 2, 128>}, {pipeline_mode = #tpu.pipeline_mode<synchronous>, transform_indices = @transform_1, window_bounds = array<i64: 128, 2>}, {pipeline_mode = #tpu.pipeline_mode<synchronous>, transform_indices = @transform_2, window_bounds = array<i64: 128, 1>}, {pipeline_mode = #tpu.pipeline_mode<synchronous>, transform_indices = @transform_3, window_bounds = array<i64: 128, 128>}, {pipeline_mode = #tpu.pipeline_mode<synchronous>, transform_indices = @transform_4, window_bounds = array<i64: 128, 1>}, {pipeline_mode = #tpu.pipeline_mode<synchronous>, transform_indices = @transform_5, window_bounds = array<i64: 1, 128>}, {transform_indices = @transform_6, window_bounds = array<i64: 1, 1>}, {transform_indices = @transform_7, window_bounds = array<i64: 1, 128>}]} {
    %c0 = arith.constant 0 : index
    %c0_0 = arith.constant 0 : index
    %0 = vector.load %arg1[%c0, %c0_0] : memref<2x128xbf16, #tpu.memory_space<vmem>>, vector<2x128xbf16>
    %c0_1 = arith.constant 0 : index
    %c0_2 = arith.constant 0 : index
    %1 = vector.load %arg2[%c0_1, %c0_2] : memref<128x2xbf16, #tpu.memory_space<vmem>>, vector<128x2xbf16>
    %2 = vector.extract_strided_slice %1 {offsets = [0, 0], sizes = [128, 1], strides = [1, 1]} : vector<128x2xbf16> to vector<128x1xbf16>
    %3 = vector.extract_strided_slice %0 {offsets = [0, 0], sizes = [1, 128], strides = [1, 1]} : vector<2x128xbf16> to vector<1x128xbf16>
    %4 = vector.broadcast %2 : vector<128x1xbf16> to vector<128x128xbf16>
    %5 = vector.broadcast %3 : vector<1x128xbf16> to vector<128x128xbf16>
    %6 = arith.mulf %4, %5 : vector<128x128xbf16>
    %7 = vector.extract_strided_slice %1 {offsets = [0, 1], sizes = [128, 1], strides = [1, 1]} : vector<128x2xbf16> to vector<128x1xbf16>
    %8 = vector.extract_strided_slice %0 {offsets = [1, 0], sizes = [1, 128], strides = [1, 1]} : vector<2x128xbf16> to vector<1x128xbf16>
    %9 = vector.broadcast %7 : vector<128x1xbf16> to vector<128x128xbf16>
    %10 = vector.broadcast %8 : vector<1x128xbf16> to vector<128x128xbf16>
    %11 = arith.mulf %9, %10 : vector<128x128xbf16>
    %12 = arith.addf %6, %11 : vector<128x128xbf16>
    %c0_3 = arith.constant 0 : index
    %c0_4 = arith.constant 0 : index
    %13 = vector.load %arg3[%c0_3, %c0_4] : memref<128x1xbf16, #tpu.memory_space<vmem>>, vector<128x1xbf16>
    %14 = vector.broadcast %13 : vector<128x1xbf16> to vector<128x128xbf16>
    %15 = arith.addf %12, %14 : vector<128x128xbf16>
    %cst = arith.constant 0.000000e+00 : bf16
    %16 = vector.broadcast %cst : bf16 to vector<128x128xbf16>
    %17 = arith.maximumf %15, %16 : vector<128x128xbf16>
    %c0_5 = arith.constant 0 : index
    %c0_6 = arith.constant 0 : index
    %18 = vector.load %arg4[%c0_5, %c0_6] : memref<128x128xbf16, #tpu.memory_space<vmem>>, vector<128x128xbf16>
    %cst_7 = arith.constant dense<0.000000e+00> : vector<128x128xf32>
    %19 = tpu.matmul %18, %17, %cst_7 {dimension_numbers = #tpu.dot_dimension_numbers<[1], [0], [0], [1], [0, 0, 1, 1], [], []>} : vector<128x128xbf16>, vector<128x128xbf16>, vector<128x128xf32> -> vector<128x128xf32>
    %c0_8 = arith.constant 0 : index
    %c0_9 = arith.constant 0 : index
    %20 = vector.load %arg5[%c0_8, %c0_9] : memref<128x1xbf16, #tpu.memory_space<vmem>>, vector<128x1xbf16>
    %21 = arith.truncf %19 : vector<128x128xf32> to vector<128x128xbf16>
    %22 = vector.broadcast %20 : vector<128x1xbf16> to vector<128x128xbf16>
    %23 = arith.addf %21, %22 : vector<128x128xbf16>
    %cst_10 = arith.constant 0.000000e+00 : bf16
    %24 = vector.broadcast %cst_10 : bf16 to vector<128x128xbf16>
    %25 = arith.maximumf %23, %24 : vector<128x128xbf16>
    %c0_11 = arith.constant 0 : index
    %c0_12 = arith.constant 0 : index
    %26 = vector.load %arg6[%c0_11, %c0_12] : memref<1x128xbf16, #tpu.memory_space<vmem>>, vector<1x128xbf16>
    %cst_13 = arith.constant dense<0.000000e+00> : vector<1x128xf32>
    %27 = tpu.matmul %26, %25, %cst_13 {dimension_numbers = #tpu.dot_dimension_numbers<[1], [0], [0], [1], [0, 0, 1, 1], [], []>} : vector<1x128xbf16>, vector<128x128xbf16>, vector<1x128xf32> -> vector<1x128xf32>
    %c0_14 = arith.constant 0 : index
    %c0_15 = arith.constant 0 : index
    %28 = memref.load %arg7[%c0_14, %c0_15] : memref<1x1xf32, #tpu.memory_space<smem>>
    %29 = vector.broadcast %28 : f32 to vector<1x128xf32>
    %30 = arith.addf %27, %29 : vector<1x128xf32>
    %c0_16 = arith.constant 0 : index
    %c0_17 = arith.constant 0 : index
    %31 = vector.load %arg8[%c0_16, %c0_17] : memref<1x128xf32, #tpu.memory_space<vmem>>, vector<1x128xf32>
    tpu.vector_store %arg8[%c0_16, %c0_17], %30 {strides = array<i32>} : memref<1x128xf32, #tpu.memory_space<vmem>>, vector<1x128xf32>,
    return
  }
  func.func @transform_0(%arg0: i32) -> (i32, i32) {
    %c0_i32 = arith.constant 0 : i32
    %c0_i32_0 = arith.constant 0 : i32
    return %c0_i32, %arg0 : i32, i32
  }
  func.func @transform_1(%arg0: i32) -> (i32, i32) {
    %c0_i32 = arith.constant 0 : i32
    %c0_i32_0 = arith.constant 0 : i32
    %c0_i32_1 = arith.constant 0 : i32
    return %c0_i32, %c0_i32_0 : i32, i32
  }
  func.func @transform_2(%arg0: i32) -> (i32, i32) {
    %c0_i32 = arith.constant 0 : i32
    %c0_i32_0 = arith.constant 0 : i32
    %c0_i32_1 = arith.constant 0 : i32
    return %c0_i32, %c0_i32_0 : i32, i32
  }
  func.func @transform_3(%arg0: i32) -> (i32, i32) {
    %c0_i32 = arith.constant 0 : i32
    %c0_i32_0 = arith.constant 0 : i32
    %c0_i32_1 = arith.constant 0 : i32
    return %c0_i32, %c0_i32_0 : i32, i32
  }
  func.func @transform_4(%arg0: i32) -> (i32, i32) {
    %c0_i32 = arith.constant 0 : i32
    %c0_i32_0 = arith.constant 0 : i32
    %c0_i32_1 = arith.constant 0 : i32
    return %c0_i32, %c0_i32_0 : i32, i32
  }
  func.func @transform_5(%arg0: i32) -> (i32, i32) {
    %c0_i32 = arith.constant 0 : i32
    %c0_i32_0 = arith.constant 0 : i32
    %c0_i32_1 = arith.constant 0 : i32
    return %c0_i32, %c0_i32_0 : i32, i32
  }
  func.func @transform_6(%arg0: i32) -> (i32, i32) {
    %c0_i32 = arith.constant 0 : i32
    %c0_i32_0 = arith.constant 0 : i32
    %c0_i32_1 = arith.constant 0 : i32
    return %c0_i32, %c0_i32_0 : i32, i32
  }
  func.func @transform_7(%arg0: i32) -> (i32, i32) {
    %c0_i32 = arith.constant 0 : i32
    %c0_i32_0 = arith.constant 0 : i32
    return %c0_i32, %arg0 : i32, i32
  }
}

</mosaic_0001>

<bundles_post_ra>
// kernel: _forward.1
= control target key start
LH: loop header
LB: loop body
LE: loop exit
PB: predicated region body
PF: predicated region fallthrough
CT: control target
= control target key end

     0   :  { %v1394_v0 = vmov 1   ;;  %v1395_v7 = vmov 0   ;;  %v53_v50 = vlaneseq  ;;  %v1396_v61 = vmov 839922192   ;;  %s1813_s1 = inlined_call_operand.vmem [shape: bf16[128,2], index: 1, kind: input, shape index: {}]   ;;  %s1814_s2 = inlined_call_operand.vmem [shape: bf16[128,1], index: 2, kind: input, shape index: {}]   ;;  %s1815_s4 = inlined_call_operand.vmem [shape: bf16[128,1], index: 4, kind: input, shape index: {}]   ;;  %s1816_s0 = inlined_call_operand.vmem [shape: bf16[2,128], index: 0, kind: input, shape index: {}]   ;;  %s1817_s3 = inlined_call_operand.vmem [shape: bf16[128,128], index: 3, kind: input, shape index: {}]   ;;  %s1818_s5 = inlined_call_operand.vmem [shape: bf16[1,128], index: 5, kind: input, shape index: {}]   ;;  %s1819_s6 = inlined_call_operand.<no memory space> [shape: f32[1,1], index: 6, kind: input, shape index: {}]   ;;  %s1820_s7 = inlined_call_operand.vmem [shape: f32[1,128], index: 7, kind: output, shape index: {}]  }
   0x1   :  { %1370 = vset.pattern.permute.xlu0 %v1394_v0  ;;  %1368 = vset.pattern.permute.xlu1 %v1394_v0  ;;  %v31_v1 = vld [vmem:[%s1813_s1 + $0x8] sm:$0xf]  ;;  %v29_v2 = vld [vmem:[%s1813_s1] sm:$0xf]  ;;  %v33_v3 = vld [vmem:[%s1813_s1 + $0x10] sm:$0xf]  ;;  %v51_v62 = vunpack.c.l.s4 %v1396_v61 }
   0x2   :  { %287 = vperm.xlu0 %1370, %v31_v1   ;;  %265 = vperm.xlu1 %1368, %v29_v2   ;;  %v30_v4 = vld [vmem:[%s1813_s1 + $0x4] sm:$0xf]  ;;  %v35_v5 = vld [vmem:[%s1813_s1 + $0x18] sm:$0xf]  ;;  %v32_v6 = vld [vmem:[%s1813_s1 + $0xc] sm:$0xf] }
   0x3   :  { %v37_v8 = vld [vmem:[%s1813_s1 + $0x20] sm:$0xf]  ;;  %v39_v9 = vld [vmem:[%s1813_s1 + $0x28] sm:$0xf]  ;;  %v1473_v11 = vld [vmem:[%s1813_s1 + $0x30] sm:$0xf] }
   0x4   :  { %v483_v10 = vld [vmem:[%s1814_s2] sm:$0xf]  ;;  %v1480_v12 = vld [vmem:[%s1813_s1 + $0x38] sm:$0xf]  ;;  %v34_v13 = vld [vmem:[%s1813_s1 + $0x14] sm:$0xf] }
   0x5   :  { %v485_v14 = vld [vmem:[%s1814_s2 + $0x8] sm:$0xf]  ;;  %v484_v15 = vld [vmem:[%s1814_s2 + $0x4] sm:$0xf]  ;;  %v486_v16 = vld [vmem:[%s1814_s2 + $0xc] sm:$0xf] }
   0x6   :  { %309 = vperm.xlu0 %1370, %v33_v3   ;;  %276 = vperm.xlu1 %1368, %v30_v4   ;;  %v36_v17 = vld [vmem:[%s1813_s1 + $0x1c] sm:$0xf]  ;;  %v488_v18 = vld [vmem:[%s1814_s2 + $0x14] sm:$0xf]  ;;  %v487_v20 = vld [vmem:[%s1814_s2 + $0x10] sm:$0xf] }
   0x7   :  { %v490_v19 = vld [vmem:[%s1814_s2 + $0x1c] sm:$0xf]  ;;  %v492_v21 = vld [vmem:[%s1814_s2 + $0x24] sm:$0xf]  ;;  %v494_v22 = vld [vmem:[%s1814_s2 + $0x2c] sm:$0xf] }
   0x8   :  { %v38_v23 = vld [vmem:[%s1813_s1 + $0x24] sm:$0xf]  ;;  %v496_v24 = vld [vmem:[%s1814_s2 + $0x34] sm:$0xf]  ;;  %v932_v25 = vld [vmem:[%s1815_s4] sm:$0xf] }
   0x9   :  { %v934_v26 = vld [vmem:[%s1815_s4 + $0x8] sm:$0xf]  ;;  %v489_v27 = vld [vmem:[%s1814_s2 + $0x18] sm:$0xf]  ;;  %v936_v28 = vld [vmem:[%s1815_s4 + $0x10] sm:$0xf] }
   0xa   :  { %331 = vperm.xlu0 %1370, %v35_v5   ;;  %1369 = vset.pattern.permute.xlu1 %v1395_v7  ;;  %v938_v29 = vld [vmem:[%s1815_s4 + $0x18] sm:$0xf]  ;;  %v40_v30 = vld [vmem:[%s1813_s1 + $0x2c] sm:$0xf]  ;;  %v940_v31 = vld [vmem:[%s1815_s4 + $0x20] sm:$0xf] }
   0xb   :  { %83 = vperm.xlu1 %1369, %v32_v6   ;;  %v942_v32 = vld [vmem:[%s1815_s4 + $0x28] sm:$0xf]  ;;  %v491_v33 = vld [vmem:[%s1814_s2 + $0x20] sm:$0xf]  ;;  %v944_v34 = vld [vmem:[%s1815_s4 + $0x30] sm:$0xf] }
   0xc   :  { %v946_v35 = vld [vmem:[%s1815_s4 + $0x38] sm:$0xf]  ;;  %v42_v36 = vld [vmem:[%s1813_s1 + $0x34] sm:$0xf]  ;;  %v493_v37 = vld [vmem:[%s1814_s2 + $0x28] sm:$0xf] }
   0xd   :  { %v44_v38 = vld [vmem:[%s1813_s1 + $0x3c] sm:$0xf]  ;;  %v495_v39 = vld [vmem:[%s1814_s2 + $0x30] sm:$0xf]  ;;  %v497_v42 = vld [vmem:[%s1814_s2 + $0x38] sm:$0xf] }
   0xe   :  { %353 = vperm.xlu0 %1370, %v37_v8   ;;  %v498_v45 = vld [vmem:[%s1814_s2 + $0x3c] sm:$0xf]  ;;  %v933_v48 = vld [vmem:[%s1815_s4 + $0x4] sm:$0xf]  ;;  %v935_v51 = vld [vmem:[%s1815_s4 + $0xc] sm:$0xf] }
   0xf   :  { %1371 = vset.pattern.permute.xlu1 %v1394_v0  ;;  %v28_v53 = vld [vmem:[%s1816_s0] sm:$0x1]  ;;  %v54_v55 = vshrl.u32 %v53_v50, 7  ;;  %v937_v56 = vld [vmem:[%s1815_s4 + $0x14] sm:$0xf]  ;;  %vm1398_vm0 = vmmov 0  }
  0x10   :  { %298 = vperm.xlu1 %1371, %v32_v6   ;;  %v440_v57 = vshrl.u32 %v28_v53, 16  ;;  %v1386_v58 = vld [vmem:[%s1817_s3] sm:$0xff]   ;;  %v939_v60 = vld [vmem:[%s1815_s4 + $0x1c] sm:$0xf] }
  0x11   :  { %1327 = vmatprep.mubr.bf16.mxu0 %v1386_v58  ;;  %v941_v6 = vld [vmem:[%s1815_s4 + $0x24] sm:$0xf] }
  0x12   :  { %375 = vperm.xlu0 %1370, %v39_v9  }
  0x14   :  { %1372 = vset.pattern.permute.xlu1 %v1395_v7 }
  0x15   :  { %501 = vperm.xlu1 %1372, %v483_v10  }
  0x16   :  { %397 = vperm.xlu0 %1370, %v1473_v11  }
  0x19   :  { %95 = vperm.xlu1 %1372, %v33_v3   ;;  %v441_v3 = vpack.i.b16 %v440_v57, %v440_v57 }
  0x1a   :  { %419 = vperm.xlu0 %1370, %v1480_v12  }
  0x1d   :  { %107 = vperm.xlu1 %1372, %v34_v13  }
  0x1e   :  { %1383 = vset.pattern.permute.xlu0 %v1395_v7 }
  0x1f   :  { %47 = vperm.xlu0 %1383, %v29_v2   ;;  %v242_v2 = vsub.s32 0, %v54_v55 }
  0x21   :  { %1373 = vset.pattern.permute.xlu1 %v1394_v0  ;;  %v446_v10 = vrot.slane %v441_v3, %v242_v2 }
  0x22   :  { %320 = vperm.xlu1 %1373, %v34_v13   ;;  %v943_v13 = vld [vmem:[%s1815_s4 + $0x2c] sm:$0xf] }
  0x23   :  { %59 = vperm.xlu0 %1383, %v30_v4   ;;  %v238_v4 = vpack.i.b16 %v28_v53, %v28_v53 }
  0x26   :  { %1374 = vset.pattern.permute.xlu1 %v1395_v7 }
  0x27   :  { %71 = vperm.xlu0 %1383, %v31_v1   ;;  %525 = vperm.xlu1 %1374, %v485_v14   ;;  %v52_v1 = vunpack.c.0.s8 %v51_v62 }
  0x2b   :  { %513 = vperm.xlu0 %1383, %v484_v15   ;;  %119 = vperm.xlu1 %1374, %v35_v5  }
  0x2f   :  { %537 = vperm.xlu0 %1383, %v486_v16   ;;  %131 = vperm.xlu1 %1374, %v36_v17   ;;  %v1635_v16 = vcombine.low %v446_v10, %v446_v10 }
  0x33   :  { %561 = vperm.xlu0 %1383, %v488_v18   ;;  %1375 = vset.pattern.permute.xlu1 %v1394_v0 }
  0x34   :  { %342 = vperm.xlu1 %1375, %v36_v17  }
  0x37   :  { %585 = vperm.xlu0 %1383, %v490_v19  }
  0x38   :  { %1376 = vset.pattern.permute.xlu1 %v1395_v7 }
  0x39   :  { %549 = vperm.xlu1 %1376, %v487_v20   ;;  %v945_v20 = vld [vmem:[%s1815_s4 + $0x34] sm:$0xf] }
  0x3b   :  { %609 = vperm.xlu0 %1383, %v492_v21  }
  0x3d   :  { %143 = vperm.xlu1 %1376, %v37_v8  }
  0x3f   :  { %633 = vperm.xlu0 %1383, %v494_v22  }
  0x41   :  { %155 = vperm.xlu1 %1376, %v38_v23  }
  0x43   :  { %657 = vperm.xlu0 %1383, %v496_v24  }
  0x45   :  { %1377 = vset.pattern.permute.xlu1 %v1394_v0 }
  0x46   :  { %364 = vperm.xlu1 %1377, %v38_v23  }
  0x47   :  { %958 = vperm.xlu0 %1383, %v932_v25  }
  0x4a   :  { %1378 = vset.pattern.permute.xlu1 %v1395_v7 }
  0x4b   :  { %982 = vperm.xlu0 %1383, %v934_v26   ;;  %573 = vperm.xlu1 %1378, %v489_v27  }
  0x4f   :  { %1006 = vperm.xlu0 %1383, %v936_v28   ;;  %167 = vperm.xlu1 %1378, %v39_v9   ;;  %v1628_v9 = vsub.s32 %v52_v1, %v54_v55 }
  0x53   :  { %1030 = vperm.xlu0 %1383, %v938_v29   ;;  %179 = vperm.xlu1 %1378, %v40_v30   ;;  %v947_v29 = vld [vmem:[%s1815_s4 + $0x3c] sm:$0xf] }
  0x57   :  { %1054 = vperm.xlu0 %1383, %v940_v31   ;;  %1379 = vset.pattern.permute.xlu1 %v1394_v0 }
  0x58   :  { %386 = vperm.xlu1 %1379, %v40_v30  }
  0x5b   :  { %1078 = vperm.xlu0 %1383, %v942_v32  }
  0x5c   :  { %1380 = vset.pattern.permute.xlu1 %v1395_v7 }
  0x5d   :  { %597 = vperm.xlu1 %1380, %v491_v33  }
  0x5f   :  { %1102 = vperm.xlu0 %1383, %v944_v34  }
  0x61   :  { %191 = vperm.xlu1 %1380, %v1473_v11   ;;  %v243_v11 = vrot.slane %v238_v4, %v242_v2 }
  0x63   :  { %1126 = vperm.xlu0 %1383, %v946_v35   ;;  %v1637_v17 = vcombine.low %v243_v11, %v243_v11 }
  0x65   :  { %203 = vperm.xlu1 %1380, %v42_v36  }
  0x69   :  { %1381 = vset.pattern.permute.xlu1 %v1394_v0 }
  0x6a   :  { %408 = vperm.xlu1 %1381, %v42_v36  }
  0x6e   :  { %1382 = vset.pattern.permute.xlu1 %v1395_v7 }
  0x6f   :  { %621 = vperm.xlu1 %1382, %v493_v37  }
  0x73   :  { %215 = vperm.xlu1 %1382, %v1480_v12  }
  0x77   :  { %227 = vperm.xlu1 %1382, %v44_v38  }
  0x7b   :  { %1384 = vset.pattern.permute.xlu1 %v1394_v0 }
  0x7c   :  { %430 = vperm.xlu1 %1384, %v44_v38  }
  0x80   :  { %1385 = vset.pattern.permute.xlu1 %v1395_v7 }
  0x81   :  { %645 = vperm.xlu1 %1385, %v495_v39   ;;  %v266_v40 = vpop.permute.xlu1 %265  ;;  %v1579_v41 = vpop.permute.xlu0 %287 }
  0x82   :  { %v274_v15 = vrot.slane %v266_v40, %v1628_v9  ;;  %v296_v21 = vrot.slane %v1579_v41, %v1628_v9 }
  0x84   :  { %v451_v24 = vmul.bf16 %v1635_v16, %v274_v15  ;;  %v453_v30 = vmul.bf16 %v1635_v16, %v296_v21 }
  0x85   :  { %669 = vperm.xlu1 %1385, %v497_v42   ;;  %v1584_v43 = vpop.permute.xlu1 %276  ;;  %v1586_v44 = vpop.permute.xlu0 %309 }
  0x86   :  { %v285_v25 = vrot.slane %v1584_v43, %v1628_v9 }
  0x88   :  { %v452_v35 = vmul.bf16 %v1635_v16, %v285_v25 }
  0x89   :  { %681 = vperm.xlu1 %1385, %v498_v45   ;;  %v1591_v46 = vpop.permute.xlu0 %331 }
  0x8a   :  { %v1593_v47 = vpop.permute.xlu1 %83 }
  0x8b   :  { %v92_v34 = vrot.slane %v1593_v47, %v1628_v9 }
  0x8d   :  { %970 = vperm.xlu1 %1385, %v933_v48   ;;  %v1598_v49 = vpop.permute.xlu0 %353  ;;  %v251_v48 = vmul.bf16 %v1637_v17, %v92_v34 }
  0x8f   :  { %v299_v52 = vpop.permute.xlu1 %298 }
  0x90   :  { %v307_v26 = vrot.slane %v299_v52, %v1628_v9 }
  0x91   :  { %994 = vperm.xlu1 %1385, %v935_v51   ;;  %v1606_v54 = vpop.permute.xlu0 %375 }
  0x92   :  { %v454_v38 = vmul.bf16 %v1635_v16, %v307_v26 }
  0x94   :  { %v502_v59 = vpop.permute.xlu1 %501  ;;  %v470_v53 = vadd.bf16 %v454_v38, %v251_v48 }
  0x95   :  { %1018 = vperm.xlu1 %1385, %v937_v56   ;;  %v1617_v63 = vpop.permute.xlu0 %397  ;;  %v510_v36 = vrot.slane %v502_v59, %v1628_v9 }
  0x98   :  { %v1619_v0 = vpop.permute.xlu1 %95 }
  0x99   :  { %1042 = vperm.xlu1 %1385, %v939_v60   ;;  %v1621_v5 = vpop.permute.xlu0 %419  ;;  %v318_v60 = vrot.slane %v1586_v44, %v1628_v9  ;;  %v104_v61 = vrot.slane %v1619_v0, %v1628_v9 }
  0x9b   :  { %v252_v44 = vmul.bf16 %v1637_v17, %v104_v61 }
  0x9c   :  { %v1626_v8 = vpop.permute.xlu1 %107 }
  0x9d   :  { %1066 = vperm.xlu1 %1385, %v941_v6   ;;  %v116_v62 = vrot.slane %v1626_v8, %v1628_v9 }
  0x9e   :  { %v48_v12 = vpop.permute.xlu0 %47 }
  0x9f   :  { %v56_v14 = vrot.slane %v48_v12, %v1628_v9  ;;  %v455_v12 = vmul.bf16 %v1635_v16, %v318_v60  ;;  %v253_v0 = vmul.bf16 %v1637_v17, %v116_v62 }
  0xa1   :  { %1090 = vperm.xlu1 %1385, %v943_v13   ;;  %v321_v18 = vpop.permute.xlu1 %320  ;;  %v248_v22 = vmul.bf16 %v1637_v17, %v56_v14 }
  0xa2   :  { %v60_v19 = vpop.permute.xlu0 %59  ;;  %v329_v51 = vrot.slane %v321_v18, %v1628_v9 }
  0xa3   :  { %v68_v23 = vrot.slane %v60_v19, %v1628_v9  ;;  %v467_v31 = vadd.bf16 %v451_v24, %v248_v22  ;;  %v471_v19 = vadd.bf16 %v455_v12, %v252_v44 }
  0xa4   :  { %v456_v4 = vmul.bf16 %v1635_v16, %v329_v51 }
  0xa5   :  { %1114 = vperm.xlu1 %1385, %v945_v20   ;;  %v249_v32 = vmul.bf16 %v1637_v17, %v68_v23  ;;  %v691_v45 = vadd.bf16 %v510_v36, %v467_v31 }
  0xa6   :  { %v72_v27 = vpop.permute.xlu0 %71  ;;  %v526_v28 = vpop.permute.xlu1 %525  ;;  %v472_v14 = vadd.bf16 %v456_v4, %v253_v0 }
  0xa7   :  { %v80_v33 = vrot.slane %v72_v27, %v1628_v9  ;;  %v468_v42 = vadd.bf16 %v452_v35, %v249_v32  ;;  %v534_v47 = vrot.slane %v526_v28, %v1628_v9  ;;  %v707_v58 = vmax.bf16 %v1395_v7, %v691_v45 }
  0xa9   :  { %v250_v37 = vmul.bf16 %v1637_v17, %v80_v33  ;;  %1138 = vperm.xlu1 %1385, %v947_v29   ;;  %v340_v29 = vrot.slane %v1591_v46, %v1628_v9 }
  0xaa   :  { %v514_v39 = vpop.permute.xlu0 %513  ;;  %v120_v40 = vpop.permute.xlu1 %119 }
  0xab   :  { %v469_v41 = vadd.bf16 %v453_v30, %v250_v37  ;;  %v522_v43 = vrot.slane %v514_v39, %v1628_v9  ;;  %v128_v30 = vrot.slane %v120_v40, %v1628_v9  ;;  %v457_v35 = vmul.bf16 %v1635_v16, %v340_v29 }
  0xad   :  { %v692_v50 = vadd.bf16 %v522_v43, %v468_v42  ;;  %v693_v56 = vadd.bf16 %v534_v47, %v469_v41  ;;  %v254_v36 = vmul.bf16 %v1637_v17, %v128_v30 }
  0xae   :  { %v538_v52 = vpop.permute.xlu0 %537  ;;  %v132_v55 = vpop.permute.xlu1 %131 }
  0xaf   :  { %v546_v57 = vrot.slane %v538_v52, %v1628_v9  ;;  %v708_v59 = vmax.bf16 %v1395_v7, %v692_v50  ;;  %v709_v6 = vmax.bf16 %v1395_v7, %v693_v56  ;;  %v140_v28 = vrot.slane %v132_v55, %v1628_v9 }
  0xb0   :  { %v473_v42 = vadd.bf16 %v457_v35, %v254_v36 }
  0xb1   :  { %v694_v1 = vadd.bf16 %v546_v57, %v470_v53  ;;  %v1270_v2 = vcombine.low %v707_v58, %v708_v59  ;;  %v255_v33 = vmul.bf16 %v1637_v17, %v140_v28  ;;  %v362_v53 = vrot.slane %v1598_v49, %v1628_v9 }
  0xb2   :  { %v562_v3 = vpop.permute.xlu0 %561 }
  0xb3   :  { %v710_v10 = vmax.bf16 %v1395_v7, %v694_v1  ;;  %v343_v11 = vpop.permute.xlu1 %342  ;;  %1311 = vmatprep.subr.bf16.mxu0 %v1270_v2  ;;  %v570_v8 = vrot.slane %v562_v3, %v1628_v9  ;;  %v459_v60 = vmul.bf16 %v1635_v16, %v362_v53 }
  0xb4   :  { %1312 = vmatpush3.bf16.msra.mxu0 %v1270_v2  ;;  %v351_v25 = vrot.slane %v343_v11, %v1628_v9 }
  0xb5   :  { %v1271_v13 = vcombine.low %v709_v6, %v710_v10  ;;  %v696_v18 = vadd.bf16 %v570_v8, %v472_v14 }
  0xb6   :  { %v458_v31 = vmul.bf16 %v1635_v16, %v351_v25  ;;  %v586_v32 = vpop.permute.xlu0 %585 }
  0xb7   :  { %1313 = vmatprep.subr.bf16.mxu0 %v1271_v13  ;;  %v712_v23 = vmax.bf16 %v1395_v7, %v696_v18  ;;  %v594_v38 = vrot.slane %v586_v32, %v1628_v9  ;;  %v384_v18 = vrot.slane %v1606_v54, %v1628_v9 }
  0xb8   :  { %v550_v15 = vpop.permute.xlu1 %549  ;;  %1314 = vmatpush3.bf16.msra.mxu0 %v1271_v13  ;;  %v474_v37 = vadd.bf16 %v458_v31, %v255_v33 }
  0xb9   :  { %v558_v20 = vrot.slane %v550_v15, %v1628_v9  ;;  %v461_v25 = vmul.bf16 %v1635_v16, %v384_v18  ;;  %v1392_v18 = vld [vmem:[%s1817_s3 + $0x30] sm:$0xff]  }
  0xba   :  { %v698_v41 = vadd.bf16 %v594_v38, %v474_v37  ;;  %v610_v59 = vpop.permute.xlu0 %609 }
  0xbb   :  { %v695_v21 = vadd.bf16 %v558_v20, %v471_v19  ;;  %v618_v61 = vrot.slane %v610_v59, %v1628_v9 }
  0xbc   :  { %v144_v22 = vpop.permute.xlu1 %143  ;;  %v714_v45 = vmax.bf16 %v1395_v7, %v698_v41 }
  0xbd   :  { %v711_v24 = vmax.bf16 %v1395_v7, %v695_v21  ;;  %v152_v55 = vrot.slane %v144_v22, %v1628_v9 }
  0xbe   :  { %v634_v21 = vpop.permute.xlu0 %633 }
  0xbf   :  { %v1272_v26 = vcombine.low %v711_v24, %v712_v23  ;;  %v256_v62 = vmul.bf16 %v1637_v17, %v152_v55  ;;  %v642_v22 = vrot.slane %v634_v21, %v1628_v9 }
  0xc0   :  { %v156_v27 = vpop.permute.xlu1 %155 }
  0xc1   :  { %1315 = vmatprep.subr.bf16.mxu0 %v1272_v26  ;;  %v164_v52 = vrot.slane %v156_v27, %v1628_v9  ;;  %v475_v4 = vadd.bf16 %v459_v60, %v256_v62 }
  0xc2   :  { %1316 = vmatpush3.bf16.msra.mxu0 %v1272_v26 }
  0xc3   :  { %v257_v57 = vmul.bf16 %v1637_v17, %v164_v52 }
  0xc5   :  { %v365_v34 = vpop.permute.xlu1 %364 }
  0xc6   :  { %v373_v47 = vrot.slane %v365_v34, %v1628_v9 }
  0xc8   :  { %v460_v56 = vmul.bf16 %v1635_v16, %v373_v47 }
  0xca   :  { %v574_v39 = vpop.permute.xlu1 %573  ;;  %v476_v1 = vadd.bf16 %v460_v56, %v257_v57 }
  0xcb   :  { %v582_v46 = vrot.slane %v574_v39, %v1628_v9  ;;  %v406_v39 = vrot.slane %v1617_v63, %v1628_v9 }
  0xcc   :  { %v700_v3 = vadd.bf16 %v618_v61, %v476_v1 }
  0xcd   :  { %v697_v43 = vadd.bf16 %v582_v46, %v473_v42 }
  0xce   :  { %v168_v40 = vpop.permute.xlu1 %167  ;;  %v716_v12 = vmax.bf16 %v1395_v7, %v700_v3 }
  0xcf   :  { %v713_v48 = vmax.bf16 %v1395_v7, %v697_v43  ;;  %v176_v14 = vrot.slane %v168_v40, %v1628_v9  ;;  %v658_v40 = vpop.permute.xlu0 %657 }
  0xd1   :  { %v1273_v50 = vcombine.low %v713_v48, %v714_v45  ;;  %v258_v23 = vmul.bf16 %v1637_v17, %v176_v14  ;;  %v463_v45 = vmul.bf16 %v1635_v16, %v406_v39  ;;  %v666_v48 = vrot.slane %v658_v40, %v1628_v9  ;;  %v1390_v14 = vld [vmem:[%s1817_s3 + $0x20] sm:$0xff]  }
  0xd2   :  { %v180_v51 = vpop.permute.xlu1 %179 }
  0xd3   :  { %1317 = vmatprep.subr.bf16.mxu0 %v1273_v50  ;;  %v188_v13 = vrot.slane %v180_v51, %v1628_v9  ;;  %v477_v28 = vadd.bf16 %v461_v25, %v258_v23 }
  0xd4   :  { %1318 = vmatpush3.bf16.msra.mxu0 %v1273_v50  ;;  %v428_v50 = vrot.slane %v1621_v5, %v1628_v9 }
  0xd5   :  { %v259_v19 = vmul.bf16 %v1637_v17, %v188_v13  ;;  %v1389_v13 = vld [vmem:[%s1817_s3 + $0x18] sm:$0xff]  }
  0xd6   :  { %v465_v59 = vmul.bf16 %v1635_v16, %v428_v50 }
  0xd7   :  { %v387_v58 = vpop.permute.xlu1 %386 }
  0xd8   :  { %v395_v44 = vrot.slane %v387_v58, %v1628_v9 }
  0xda   :  { %v462_v15 = vmul.bf16 %v1635_v16, %v395_v44 }
  0xdc   :  { %v598_v2 = vpop.permute.xlu1 %597  ;;  %v478_v24 = vadd.bf16 %v462_v15, %v259_v19  ;;  %v1391_v15 = vld [vmem:[%s1817_s3 + $0x28] sm:$0xff]   ;;  %v1393_v19 = vld [vmem:[%s1817_s3 + $0x38] sm:$0xff]  }
  0xdd   :  { %v606_v49 = vrot.slane %v598_v2, %v1628_v9 }
  0xde   :  { %v702_v27 = vadd.bf16 %v642_v22, %v478_v24  ;;  %v959_v22 = vpop.permute.xlu0 %958 }
  0xdf   :  { %v699_v6 = vadd.bf16 %v606_v49, %v475_v4 }
  0xe0   :  { %v192_v10 = vpop.permute.xlu1 %191  ;;  %v718_v32 = vmax.bf16 %v1395_v7, %v702_v27 }
  0xe1   :  { %v715_v11 = vmax.bf16 %v1395_v7, %v699_v6  ;;  %v200_v37 = vrot.slane %v192_v10, %v1628_v9 }
  0xe2   :  { %v983_v24 = vpop.permute.xlu0 %982 }
  0xe3   :  { %v1274_v0 = vcombine.low %v715_v11, %v716_v12  ;;  %v260_v46 = vmul.bf16 %v1637_v17, %v200_v37 }
  0xe4   :  { %v204_v8 = vpop.permute.xlu1 %203 }
  0xe5   :  { %1319 = vmatprep.subr.bf16.mxu0 %v1274_v0  ;;  %v212_v36 = vrot.slane %v204_v8, %v1628_v9  ;;  %v479_v53 = vadd.bf16 %v463_v45, %v260_v46  ;;  %v1388_v8 = vld [vmem:[%s1817_s3 + $0x10] sm:$0xff]  }
  0xe6   :  { %1320 = vmatpush3.bf16.msra.mxu0 %v1274_v0 }
  0xe7   :  { %v261_v41 = vmul.bf16 %v1637_v17, %v212_v36  ;;  %v991_v36 = vrot.slane %v983_v24, %v1628_v9 }
  0xe9   :  { %v409_v20 = vpop.permute.xlu1 %408 }
  0xea   :  { %v417_v33 = vrot.slane %v409_v20, %v1628_v9  ;;  %v1397_v20 = vmov 0.0  }
  0xeb   :  { %1343 = vmatprep.subr.bf16.mxu1 %v1397_v20  ;;  %1359 = vmatprep.mubr.msk.bf16.mxu1 %vm1398_vm0, %v1397_v20 }
  0xec   :  { %v464_v38 = vmul.bf16 %v1635_v16, %v417_v33 }
  0xee   :  { %v622_v26 = vpop.permute.xlu1 %621  ;;  %v480_v43 = vadd.bf16 %v464_v38, %v261_v41 }
  0xef   :  { %v630_v29 = vrot.slane %v622_v26, %v1628_v9  ;;  %v1007_v26 = vpop.permute.xlu0 %1006 }
  0xf0   :  { %v704_v52 = vadd.bf16 %v666_v48, %v480_v43  ;;  %v1015_v50 = vrot.slane %v1007_v26, %v1628_v9 }
  0xf1   :  { %v701_v30 = vadd.bf16 %v630_v29, %v477_v28 }
  0xf2   :  { %v216_v31 = vpop.permute.xlu1 %215  ;;  %v720_v1 = vmax.bf16 %v1395_v7, %v704_v52 }
  0xf3   :  { %v717_v54 = vmax.bf16 %v1395_v7, %v701_v30  ;;  %v224_v47 = vrot.slane %v216_v31, %v1628_v9  ;;  %v1031_v30 = vpop.permute.xlu0 %1030 }
  0xf5   :  { %v1275_v34 = vcombine.low %v717_v54, %v718_v32  ;;  %v262_v56 = vmul.bf16 %v1637_v17, %v224_v47  ;;  %v967_v54 = vrot.slane %v959_v22, %v1628_v9 }
  0xf6   :  { %v228_v35 = vpop.permute.xlu1 %227 }
  0xf7   :  { %1321 = vmatprep.subr.bf16.mxu0 %v1275_v34  ;;  %v236_v57 = vrot.slane %v228_v35, %v1628_v9  ;;  %v481_v3 = vadd.bf16 %v465_v59, %v262_v56  ;;  %v1055_v46 = vpop.permute.xlu0 %1054  ;;  %v1039_v56 = vrot.slane %v1031_v30, %v1628_v9 }
  0xf8   :  { %1322 = vmatpush3.bf16.msra.mxu0 %v1275_v34 }
  0xf9   :  { %v263_v2 = vmul.bf16 %v1637_v17, %v236_v57  ;;  %v1387_v17 = vld [vmem:[%s1817_s3 + $0x8] sm:$0xff]  }
  0xfb   :  { %v431_v42 = vpop.permute.xlu1 %430 }
  0xfc   :  { %v439_v63 = vrot.slane %v431_v42, %v1628_v9 }
  0xfe   :  { %v466_v61 = vmul.bf16 %v1635_v16, %v439_v63 }
 0x100   :  { %v646_v51 = vpop.permute.xlu1 %645  ;;  %v482_v10 = vadd.bf16 %v466_v61, %v263_v2 }
 0x101   :  { %v654_v55 = vrot.slane %v646_v51, %v1628_v9 }
 0x103   :  { %v703_v58 = vadd.bf16 %v654_v55, %v479_v53 }
 0x104   :  { %v670_v60 = vpop.permute.xlu1 %669 }
 0x105   :  { %v719_v62 = vmax.bf16 %v1395_v7, %v703_v58  ;;  %v678_v5 = vrot.slane %v670_v60, %v1628_v9  ;;  %v1079_v60 = vpop.permute.xlu0 %1078 }
 0x107   :  { %v1276_v4 = vcombine.low %v719_v62, %v720_v1  ;;  %v705_v6 = vadd.bf16 %v678_v5, %v481_v3 }
 0x108   :  { %v682_v49 = vpop.permute.xlu1 %681 }
 0x109   :  { %v690_v11 = vrot.slane %v682_v49, %v1628_v9  ;;  %1323 = vmatprep.subr.bf16.mxu0 %v1276_v4  ;;  %v721_v16 = vmax.bf16 %v1395_v7, %v705_v6  ;;  %v1063_v6 = vrot.slane %v1055_v46, %v1628_v9 }
 0x10a   :  { %1324 = vmatpush3.bf16.msra.mxu0 %v1276_v4 }
 0x10b   :  { %v706_v12 = vadd.bf16 %v690_v11, %v482_v10 }
 0x10c   :  { %v971_v21 = vpop.permute.xlu1 %970 }
 0x10d   :  { %v722_v44 = vmax.bf16 %v1395_v7, %v706_v12  ;;  %v979_v28 = vrot.slane %v971_v21, %v1628_v9  ;;  %v1103_v12 = vpop.permute.xlu0 %1102 }
 0x10e   :  { %v1111_v26 = vrot.slane %v1103_v12, %v1628_v9 }
 0x10f   :  { %v1277_v0 = vcombine.low %v721_v16, %v722_v44  ;;  %v1278_v37 = vcombine.low %v967_v54, %v979_v28 }
 0x110   :  { %v995_v23 = vpop.permute.xlu1 %994 }
 0x111   :  { %1325 = vmatprep.subr.bf16.mxu0 %v1277_v0  ;;  %v1003_v32 = vrot.slane %v995_v23, %v1628_v9  ;;  %v1127_v24 = vpop.permute.xlu0 %1126 }
 0x112   :  { %1326 = vmatpush3.bf16.msra.mxu0 %v1277_v0  ;;  %v1087_v0 = vrot.slane %v1079_v60, %v1628_v9 }
 0x113   :  { %v1279_v41 = vcombine.low %v991_v36, %v1003_v32 }
 0x114   :  { %v1019_v25 = vpop.permute.xlu1 %1018 }
 0x115   :  { %1328 = vmatmul.mubr.bf16.vlgmr.msra.gmra.mrb[0].mxu0 %v1387_v17  ;;  %v1027_v43 = vrot.slane %v1019_v25, %v1628_v9 }
 0x116   :  { %1331 = vmatprep.mubr.bf16.mxu0 %v1388_v8 }
 0x117   :  { %v1280_v57 = vcombine.low %v1015_v50, %v1027_v43 }
 0x118   :  { %v1043_v27 = vpop.permute.xlu1 %1042 }
 0x119   :  { %v1051_v51 = vrot.slane %v1043_v27, %v1628_v9 }
 0x11b   :  { %v1281_v61 = vcombine.low %v1039_v56, %v1051_v51 }
 0x11c   :  { %v1067_v39 = vpop.permute.xlu1 %1066 }
 0x11d   :  { %1332 = vmatmul.mubr.bf16.gmra.mrb[4].mxu0 %v1389_v13  ;;  %v1075_v5 = vrot.slane %v1067_v39, %v1628_v9  ;;  %v1214_v39 = vstv %s1819_s6 }
 0x11e   :  { %1335 = vmatprep.mubr.bf16.mxu0 %v1390_v14 }
 0x11f   :  { %v1282_v17 = vcombine.low %v1063_v6, %v1075_v5 }
 0x120   :  { %v1091_v63 = vpop.permute.xlu1 %1090 }
 0x121   :  { %v1099_v10 = vrot.slane %v1091_v63, %v1628_v9 }
 0x123   :  { %v1283_v14 = vcombine.low %v1087_v0, %v1099_v10 }
 0x124   :  { %v1115_v4 = vpop.permute.xlu1 %1114 }
 0x125   :  { %1336 = vmatmul.mubr.bf16.gmra.mrb[8].mxu0 %v1391_v15 }
 0x126   :  { %1339 = vmatprep.mubr.bf16.mxu0 %v1392_v18 }
 0x128   :  { %v1139_v18 = vpop.permute.xlu1 %1138 }
 0x129   :  { %v1147_v27 = vrot.slane %v1139_v18, %v1628_v9 }
 0x12d   :  { %1340 = vmatmul.mubr.bf16.gmra.mrb[12].mxu0 %v1393_v19  ;;  %v1123_v19 = vrot.slane %v1115_v4, %v1628_v9 }
 0x12f   :  { %v1284_v54 = vcombine.low %v1111_v26, %v1123_v19 }
 0x1e8   :  { %v1329_v29 = vpop.f32.mrb[0].mxu0 }
 0x1e9   :  { %v869_v31 = vpop.f32.mrb[1].mxu0 }
 0x1ea   :  { %v1330_v33 = vpop.f32.mrb[2].mxu0 }
 0x1eb   :  { %v949_v34 = vpack.c.bf16 %v1330_v33, %v1329_v29  ;;  %v872_v35 = vpop.f32.mrb[3].mxu0 }
 0x1ec   :  { %v948_v38 = vpack.c.bf16 %v872_v35, %v869_v31  ;;  %v1135_v31 = vrot.slane %v1127_v24, %v1628_v9  ;;  %v1212_v9 = vld [vmem:[%s1818_s5] sm:$0x1] }
 0x1ed   :  { %v1197_v40 = vadd.bf16 %v1279_v41, %v949_v34 }
 0x1ee   :  { %v1196_v42 = vadd.bf16 %v1278_v37, %v948_v38  ;;  %v1285_v34 = vcombine.low %v1135_v31, %v1147_v27 }
 0x1ef   :  { %v1205_v59 = vmax.bf16 %v1395_v7, %v1197_v40 }
 0x1f0   :  { %v1333_v45 = vpop.f32.mrb[4].mxu0  ;;  %v1204_v48 = vmax.bf16 %v1395_v7, %v1196_v42 }
 0x1f1   :  { %v885_v47 = vpop.f32.mrb[5].mxu0 }
 0x1f2   :  { %v1334_v52 = vpop.f32.mrb[6].mxu0  ;;  %1344 = vmatpush3.bf16.msra.mxu1 %v1204_v48 }
 0x1f3   :  { %v951_v53 = vpack.c.bf16 %v1334_v52, %v1333_v45  ;;  %v888_v55 = vpop.f32.mrb[7].mxu0  ;;  %1345 = vmatprep.subr.bf16.mxu1 %v1397_v20 }
 0x1f4   :  { %v950_v58 = vpack.c.bf16 %v888_v55, %v885_v47 }
 0x1f5   :  { %v1199_v1 = vadd.bf16 %v1281_v61, %v951_v53 }
 0x1f6   :  { %v1198_v62 = vadd.bf16 %v1280_v57, %v950_v58  ;;  %1346 = vmatpush3.bf16.msra.mxu1 %v1205_v59 }
 0x1f7   :  { %1347 = vmatprep.subr.bf16.mxu1 %v1397_v20  ;;  %v1207_v13 = vmax.bf16 %v1395_v7, %v1199_v1 }
 0x1f8   :  { %v1337_v2 = vpop.f32.mrb[8].mxu0  ;;  %v1206_v3 = vmax.bf16 %v1395_v7, %v1198_v62 }
 0x1f9   :  { %v901_v49 = vpop.f32.mrb[9].mxu0 }
 0x1fa   :  { %v1338_v11 = vpop.f32.mrb[10].mxu0  ;;  %1348 = vmatpush3.bf16.msra.mxu1 %v1206_v3 }
 0x1fb   :  { %v953_v16 = vpack.c.bf16 %v1338_v11, %v1337_v2  ;;  %v904_v44 = vpop.f32.mrb[11].mxu0  ;;  %1349 = vmatprep.subr.bf16.mxu1 %v1397_v20 }
 0x1fc   :  { %v952_v8 = vpack.c.bf16 %v904_v44, %v901_v49 }
 0x1fd   :  { %v1201_v21 = vadd.bf16 %v1283_v14, %v953_v16 }
 0x1fe   :  { %v1200_v15 = vadd.bf16 %v1282_v17, %v952_v8  ;;  %1350 = vmatpush3.bf16.msra.mxu1 %v1207_v13 }
 0x1ff   :  { %1351 = vmatprep.subr.bf16.mxu1 %v1397_v20  ;;  %v1209_v33 = vmax.bf16 %v1395_v7, %v1201_v21 }
 0x200   :  { %v1341_v22 = vpop.f32.mrb[12].mxu0  ;;  %v1208_v23 = vmax.bf16 %v1395_v7, %v1200_v15 }
 0x201   :  { %v917_v25 = vpop.f32.mrb[13].mxu0 }
 0x202   :  { %v1342_v28 = vpop.f32.mrb[14].mxu0  ;;  %1352 = vmatpush3.bf16.msra.mxu1 %v1208_v23 }
 0x203   :  { %v955_v29 = vpack.c.bf16 %v1342_v28, %v1341_v22  ;;  %v920_v30 = vpop.f32.mrb[15].mxu0  ;;  %1353 = vmatprep.subr.bf16.mxu1 %v1397_v20 }
 0x204   :  { %v954_v32 = vpack.c.bf16 %v920_v30, %v917_v25 }
 0x205   :  { %v1203_v36 = vadd.bf16 %v1285_v34, %v955_v29 }
 0x206   :  { %v1202_v35 = vadd.bf16 %v1284_v54, %v954_v32  ;;  %1354 = vmatpush3.bf16.msra.mxu1 %v1209_v33 }
 0x207   :  { %1355 = vmatprep.subr.bf16.mxu1 %v1397_v20  ;;  %v1211_v38 = vmax.bf16 %v1395_v7, %v1203_v36 }
 0x208   :  { %v1210_v37 = vmax.bf16 %v1395_v7, %v1202_v35 }
 0x20a   :  { %1356 = vmatpush3.bf16.msra.mxu1 %v1210_v37 }
 0x20b   :  { %1357 = vmatprep.subr.bf16.mxu1 %v1397_v20 }
 0x20e   :  { %1358 = vmatpush3.bf16.msra.mxu1 %v1211_v38 }
 0x211   :  { %1360 = vmatmul.mubr.bf16.vlgmr.msra.gmra.mrb[0].mxu1 %v1212_v9 }
 0x2e4   :  { %v1249_v41 = vpop.f32.mrb[0].mxu1 }
 0x2e5   :  { %v1250_v42 = vadd.f32 %v1249_v41, %v1214_v39  ;;  %v1361_v46 = vpop.f32.mrb[1].mxu1 }
 0x2e6   :  { %v1252_v43 = vpop.f32.mrb[2].mxu1 }
 0x2e7   :  { %1255 = vst [vmem:[%s1820_s7] sm:$0x1] %v1250_v42  ;;  %v1362_v20 = vpop.f32.mrb[3].mxu1 }

</bundles_post_ra>
